<compile_context>
chip_gen: v7x
topology: tpu7x:2x2x1
jax: 0.10.0
libtpu: 0.0.40
codegen_flags: <defaults>
</compile_context>

<pallas_src>
import jax
import jax.numpy as jnp
from jax.experimental import pallas as pl
from jax.experimental.pallas import tpu as pltpu

_SUBLANE_ROUND = 16       # bf16 packs 16 sublanes/vreg (f32 needs 8; 16 covers both)
_OUT_LANE_ROUND = 8       # pad num_actions to a multiple of 8 (full-dim block is legal)
_DEFAULT_TILE_CAP = 2048  # per-generation sweep knob; 2048 is the safe middle ground


def _cdiv(a, b):
    return -(-a // b)


def _mlp_kernel(x_ref,
                w1_ref, b1_ref,
                w2_ref, b2_ref,
                w3_ref, b3_ref,
                w4_ref, b4_ref,
                o_ref):
    # Matmul operands use the weight dtype (bf16 or f32); accumulation, bias
    # add and ReLU are all float32 (v5e VPU/EUP have no bf16).
    op_dt = w1_ref.dtype
    # In-kernel cast of x: cheap VPU pack that hides under the MXU/DMA instead
    # of a separate wrapper-side XLA cast pass over HBM.
    x = x_ref[...].astype(op_dt)
    h = jnp.dot(x, w1_ref[...], preferred_element_type=jnp.float32) + b1_ref[...]
    h = jnp.maximum(h, 0.0)
    h = jnp.dot(h.astype(op_dt), w2_ref[...],
                preferred_element_type=jnp.float32) + b2_ref[...]
    h = jnp.maximum(h, 0.0)
    h = jnp.dot(h.astype(op_dt), w3_ref[...],
                preferred_element_type=jnp.float32) + b3_ref[...]
    h = jnp.maximum(h, 0.0)
    q = jnp.dot(h.astype(op_dt), w4_ref[...],
                preferred_element_type=jnp.float32) + b4_ref[...]
    o_ref[...] = q.astype(o_ref.dtype)


def _derive_batch_tiling(B, cap):
    """Balanced batch tiles.

    n_tiles is chosen first (cdiv(B, cap)), then the tile is round_up(cdiv(B,
    n_tiles), 16) so padding stays under one sublane group per tile instead of
    up to ~2x at unlucky batch sizes.  For large B we force at least two grid
    steps so the "parallel" batch axis can be sharded across v7x's two
    TensorCores.
    """
    cap = max(_SUBLANE_ROUND, (cap // _SUBLANE_ROUND) * _SUBLANE_ROUND)
    n_tiles = _cdiv(B, cap)
    if n_tiles == 1 and B >= 512:
        n_tiles = 2  # give v7x megacore two tiles to shard
    bt = _cdiv(_cdiv(B, n_tiles), _SUBLANE_ROUND) * _SUBLANE_ROUND
    n_tiles = _cdiv(B, bt)
    return bt, n_tiles


def prepare_params(params, *, use_bf16=True):
    """One-time param prep (hoisted out of the per-call forward path).

    * Pads layer-4 weight/bias from num_actions to a multiple of 8 lanes.
    * Casts weights to bf16 (MXU operands); biases stay float32.
    """
    op_dt = jnp.bfloat16 if use_bf16 else jnp.float32
    A = params["w4"].shape[1]
    A_pad = max(_OUT_LANE_ROUND, _cdiv(A, _OUT_LANE_ROUND) * _OUT_LANE_ROUND)
    w4 = params["w4"]
    b4 = params["b4"]
    if A_pad != A:
        w4 = jnp.pad(w4, ((0, 0), (0, A_pad - A)))
        b4 = jnp.pad(b4, ((0, 0), (0, A_pad - A)))
    return {
        "w1": params["w1"].astype(op_dt), "b1": params["b1"].astype(jnp.float32),
        "w2": params["w2"].astype(op_dt), "b2": params["b2"].astype(jnp.float32),
        "w3": params["w3"].astype(op_dt), "b3": params["b3"].astype(jnp.float32),
        "w4": w4.astype(op_dt),           "b4": b4.astype(jnp.float32),
        "num_actions": A,
    }


def one_hot_dqn_forward(state, prepared, *, batch_tile=None):
    """Fused OneHotDQN MLP on TPU via Pallas.

    state:    (B, num_inputs) float32
    prepared: output of prepare_params(params).
    """
    B, F = state.shape
    w1, b1 = prepared["w1"], prepared["b1"]
    w2, b2 = prepared["w2"], prepared["b2"]
    w3, b3 = prepared["w3"], prepared["b3"]
    w4, b4 = prepared["w4"], prepared["b4"]
    H = w1.shape[1]
    A_pad = w4.shape[1]
    A = prepared["num_actions"]

    cap = _DEFAULT_TILE_CAP if batch_tile is None else batch_tile
    bt, n_tiles = _derive_batch_tiling(B, cap)
    B_pad = bt * n_tiles
    # x stays float32 here; the bf16 operand cast happens inside the kernel.
    x = state if B_pad == B else jnp.pad(state, ((0, B_pad - B), (0, 0)))

    def rep(_i):  # weights / biases: same (only) block for every grid step
        return (0, 0)

    # Advisory cost so XLA schedules the surrounding ops (pad, output slice)
    # around the custom call correctly.
    weight_bytes = sum(
        int(a.size) * a.dtype.itemsize
        for a in (w1, b1, w2, b2, w3, b3, w4, b4))
    cost = pl.CostEstimate(
        flops=2 * B_pad * (F * H + H * H + H * H + H * A_pad),
        transcendentals=0,
        bytes_accessed=B_pad * F * 4 + B_pad * A_pad * 4 + weight_bytes,
    )

    # NOTE: the 8 weight/bias specs could use pipeline_mode=pl.Buffered(1)
    # (constant index_map, never re-fetched); the saving is a few KiB of VMEM
    # and some bookkeeping, so it is left at the default for compatibility.
    out = pl.pallas_call(
        _mlp_kernel,
        out_shape=jax.ShapeDtypeStruct((B_pad, A_pad), jnp.float32),
        grid_spec=pltpu.PrefetchScalarGridSpec(
            num_scalar_prefetch=0,
            grid=(n_tiles,),
            in_specs=[
                # x tile: the only streamed input.
                pl.BlockSpec((bt, F), lambda i: (i, 0)),
                pl.BlockSpec((F, H), rep), pl.BlockSpec((1, H), rep),          # layer 1
                pl.BlockSpec((H, H), rep), pl.BlockSpec((1, H), rep),          # layer 2
                pl.BlockSpec((H, H), rep), pl.BlockSpec((1, H), rep),          # layer 3
                pl.BlockSpec((H, A_pad), rep), pl.BlockSpec((1, A_pad), rep),  # layer 4
            ],
            out_specs=pl.BlockSpec((bt, A_pad), lambda i: (i, 0)),
        ),
        compiler_params=pltpu.CompilerParams(
            dimension_semantics=("parallel",)),
        cost_estimate=cost,
    )(x, w1, b1, w2, b2, w3, b3, w4, b4)

    return out[:B, :A]


def init_params(key, num_inputs, num_actions, hidden=64):
    """Deterministic init mimicking torch.nn.Linear's default
    U(-1/sqrt(fan_in), 1/sqrt(fan_in)) for both weights and biases."""
    dims = [(num_inputs, hidden), (hidden, hidden), (hidden, hidden),
            (hidden, num_actions)]
    params = {}
    for idx, (fan_in, fan_out) in enumerate(dims, start=1):
        key, kw, kb = jax.random.split(key, 3)
        bound = 1.0 / jnp.sqrt(float(fan_in))
        params[f"w{idx}"] = jax.random.uniform(
            kw, (fan_in, fan_out), jnp.float32, -bound, bound)
        params[f"b{idx}"] = jax.random.uniform(
            kb, (1, fan_out), jnp.float32, -bound, bound)
    return params


def _reference_forward_f32(state, params):
    h = jnp.maximum(state @ params["w1"] + params["b1"], 0.0)
    h = jnp.maximum(h @ params["w2"] + params["b2"], 0.0)
    h = jnp.maximum(h @ params["w3"] + params["b3"], 0.0)
    return h @ params["w4"] + params["b4"]


def _reference_forward_matched(state, params, op_dt):
    """Same casting discipline as the kernel (op_dt operands, f32 accumulate)."""
    h = jnp.dot(state.astype(op_dt), params["w1"].astype(op_dt),
                preferred_element_type=jnp.float32) + params["b1"]
    h = jnp.maximum(h, 0.0)
    h = jnp.dot(h.astype(op_dt), params["w2"].astype(op_dt),
                preferred_element_type=jnp.float32) + params["b2"]
    h = jnp.maximum(h, 0.0)
    h = jnp.dot(h.astype(op_dt), params["w3"].astype(op_dt),
                preferred_element_type=jnp.float32) + params["b3"]
    h = jnp.maximum(h, 0.0)
    return jnp.dot(h.astype(op_dt), params["w4"].astype(op_dt),
                   preferred_element_type=jnp.float32) + params["b4"]


if __name__ == "__main__":
    num_inputs = 16      # num_feats
    num_actions = 4
    batch = 37           # deliberately not a multiple of 16: exercises padding path

    key = jax.random.PRNGKey(0)
    key, kx = jax.random.split(key)
    state = jax.random.normal(kx, (batch, num_inputs), jnp.float32)
    params = init_params(key, num_inputs, num_actions)

    # One-time param prep (pad/cast hoisted out of the per-call forward path).
    prepared = prepare_params(params, use_bf16=True)

    q_vals = jax.block_until_ready(one_hot_dqn_forward(state, prepared))
    assert q_vals.shape == (batch, num_actions)

    # Exact-semantics check vs a reference with the same bf16-operand / f32-acc
    # discipline as the kernel.
    matched = _reference_forward_matched(state, params, jnp.bfloat16)
    assert jnp.allclose(q_vals, matched, atol=1e-3, rtol=1e-3), \
        "mismatch vs matched-precision reference"

    # Loose check vs the pure-f32 PyTorch-equivalent reference.
    ref = _reference_forward_f32(state, params)
    assert jnp.allclose(q_vals, ref, atol=5e-2, rtol=5e-2), \
        "mismatch vs f32 reference"

    # Pure-f32 kernel path must match the f32 reference tightly.
    prepared_f32 = prepare_params(params, use_bf16=False)
    q_f32 = jax.block_until_ready(one_hot_dqn_forward(state, prepared_f32))
    assert jnp.allclose(q_f32, ref, atol=1e-4, rtol=1e-4), \
        "f32 kernel path mismatch vs f32 reference"

    # Exercise the multi-tile / balanced-tiling path (>=2 grid steps).
    big_B = 600
    key, kb = jax.random.split(key)
    big_state = jax.random.normal(kb, (big_B, num_inputs), jnp.float32)
    q_big = jax.block_until_ready(
        one_hot_dqn_forward(big_state, prepared, batch_tile=512))
    assert q_big.shape == (big_B, num_actions)
    ref_big = _reference_forward_f32(big_state, params)
    assert jnp.allclose(q_big, ref_big, atol=5e-2, rtol=5e-2), \
        "multi-tile mismatch vs f32 reference"

    print("KERNEL_OK")
</pallas_src>

<mosaic_0001>
module attributes {stable_mosaic.version = 11 : i64} {
  func.func @_mlp_kernel(%arg0: i32, %arg1: memref<48x16xf32, #tpu.memory_space<vmem>>, %arg2: memref<16x64xbf16, #tpu.memory_space<vmem>>, %arg3: memref<1x64xf32, #tpu.memory_space<vmem>>, %arg4: memref<64x64xbf16, #tpu.memory_space<vmem>>, %arg5: memref<1x64xf32, #tpu.memory_space<vmem>>, %arg6: memref<64x64xbf16, #tpu.memory_space<vmem>>, %arg7: memref<1x64xf32, #tpu.memory_space<vmem>>, %arg8: memref<64x8xbf16, #tpu.memory_space<vmem>>, %arg9: memref<1x8xf32, #tpu.memory_space<vmem>>, %arg10: memref<48x8xf32, #tpu.memory_space<vmem>>) attributes {dimension_semantics = [#tpu.dimension_semantics<parallel>], iteration_bounds = array<i64: 1>, scalar_prefetch = 0 : i64, scratch_operands = 0 : i64, tpu.core_type = #tpu.core_type<tc>, window_params = [{transform_indices = @transform_0, window_bounds = array<i64: 48, 16>}, {pipeline_mode = #tpu.pipeline_mode<synchronous>, transform_indices = @transform_1, window_bounds = array<i64: 16, 64>}, {pipeline_mode = #tpu.pipeline_mode<synchronous>, transform_indices = @transform_2, window_bounds = array<i64: 1, 64>}, {pipeline_mode = #tpu.pipeline_mode<synchronous>, transform_indices = @transform_3, window_bounds = array<i64: 64, 64>}, {pipeline_mode = #tpu.pipeline_mode<synchronous>, transform_indices = @transform_4, window_bounds = array<i64: 1, 64>}, {pipeline_mode = #tpu.pipeline_mode<synchronous>, transform_indices = @transform_5, window_bounds = array<i64: 64, 64>}, {pipeline_mode = #tpu.pipeline_mode<synchronous>, transform_indices = @transform_6, window_bounds = array<i64: 1, 64>}, {pipeline_mode = #tpu.pipeline_mode<synchronous>, transform_indices = @transform_7, window_bounds = array<i64: 64, 8>}, {pipeline_mode = #tpu.pipeline_mode<synchronous>, transform_indices = @transform_8, window_bounds = array<i64: 1, 8>}, {transform_indices = @transform_9, window_bounds = array<i64: 48, 8>}]} {
    %c0 = arith.constant 0 : index
    %c0_0 = arith.constant 0 : index
    %0 = vector.load %arg1[%c0, %c0_0] : memref<48x16xf32, #tpu.memory_space<vmem>>, vector<48x16xf32>
    %1 = arith.truncf %0 : vector<48x16xf32> to vector<48x16xbf16>
    %c0_1 = arith.constant 0 : index
    %c0_2 = arith.constant 0 : index
    %2 = vector.load %arg2[%c0_1, %c0_2] : memref<16x64xbf16, #tpu.memory_space<vmem>>, vector<16x64xbf16>
    %cst = arith.constant dense<0.000000e+00> : vector<48x64xf32>
    %3 = tpu.matmul %1, %2, %cst {dimension_numbers = #tpu.dot_dimension_numbers<[1], [0], [0], [1], [0, 0, 1, 1], [], []>} : vector<48x16xbf16>, vector<16x64xbf16>, vector<48x64xf32> -> vector<48x64xf32>
    %c0_3 = arith.constant 0 : index
    %c0_4 = arith.constant 0 : index
    %4 = vector.load %arg3[%c0_3, %c0_4] : memref<1x64xf32, #tpu.memory_space<vmem>>, vector<1x64xf32>
    %5 = vector.broadcast %4 : vector<1x64xf32> to vector<48x64xf32>
    %6 = arith.addf %3, %5 : vector<48x64xf32>
    %cst_5 = arith.constant 0.000000e+00 : f32
    %7 = vector.broadcast %cst_5 : f32 to vector<48x64xf32>
    %8 = arith.maximumf %6, %7 : vector<48x64xf32>
    %9 = arith.truncf %8 : vector<48x64xf32> to vector<48x64xbf16>
    %c0_6 = arith.constant 0 : index
    %c0_7 = arith.constant 0 : index
    %10 = vector.load %arg4[%c0_6, %c0_7] : memref<64x64xbf16, #tpu.memory_space<vmem>>, vector<64x64xbf16>
    %cst_8 = arith.constant dense<0.000000e+00> : vector<48x64xf32>
    %11 = tpu.matmul %9, %10, %cst_8 {dimension_numbers = #tpu.dot_dimension_numbers<[1], [0], [0], [1], [0, 0, 1, 1], [], []>} : vector<48x64xbf16>, vector<64x64xbf16>, vector<48x64xf32> -> vector<48x64xf32>
    %c0_9 = arith.constant 0 : index
    %c0_10 = arith.constant 0 : index
    %12 = vector.load %arg5[%c0_9, %c0_10] : memref<1x64xf32, #tpu.memory_space<vmem>>, vector<1x64xf32>
    %13 = vector.broadcast %12 : vector<1x64xf32> to vector<48x64xf32>
    %14 = arith.addf %11, %13 : vector<48x64xf32>
    %cst_11 = arith.constant 0.000000e+00 : f32
    %15 = vector.broadcast %cst_11 : f32 to vector<48x64xf32>
    %16 = arith.maximumf %14, %15 : vector<48x64xf32>
    %17 = arith.truncf %16 : vector<48x64xf32> to vector<48x64xbf16>
    %c0_12 = arith.constant 0 : index
    %c0_13 = arith.constant 0 : index
    %18 = vector.load %arg6[%c0_12, %c0_13] : memref<64x64xbf16, #tpu.memory_space<vmem>>, vector<64x64xbf16>
    %cst_14 = arith.constant dense<0.000000e+00> : vector<48x64xf32>
    %19 = tpu.matmul %17, %18, %cst_14 {dimension_numbers = #tpu.dot_dimension_numbers<[1], [0], [0], [1], [0, 0, 1, 1], [], []>} : vector<48x64xbf16>, vector<64x64xbf16>, vector<48x64xf32> -> vector<48x64xf32>
    %c0_15 = arith.constant 0 : index
    %c0_16 = arith.constant 0 : index
    %20 = vector.load %arg7[%c0_15, %c0_16] : memref<1x64xf32, #tpu.memory_space<vmem>>, vector<1x64xf32>
    %21 = vector.broadcast %20 : vector<1x64xf32> to vector<48x64xf32>
    %22 = arith.addf %19, %21 : vector<48x64xf32>
    %cst_17 = arith.constant 0.000000e+00 : f32
    %23 = vector.broadcast %cst_17 : f32 to vector<48x64xf32>
    %24 = arith.maximumf %22, %23 : vector<48x64xf32>
    %25 = arith.truncf %24 : vector<48x64xf32> to vector<48x64xbf16>
    %c0_18 = arith.constant 0 : index
    %c0_19 = arith.constant 0 : index
    %26 = vector.load %arg8[%c0_18, %c0_19] : memref<64x8xbf16, #tpu.memory_space<vmem>>, vector<64x8xbf16>
    %cst_20 = arith.constant dense<0.000000e+00> : vector<48x8xf32>
    %27 = tpu.matmul %25, %26, %cst_20 {dimension_numbers = #tpu.dot_dimension_numbers<[1], [0], [0], [1], [0, 0, 1, 1], [], []>} : vector<48x64xbf16>, vector<64x8xbf16>, vector<48x8xf32> -> vector<48x8xf32>
    %c0_21 = arith.constant 0 : index
    %c0_22 = arith.constant 0 : index
    %28 = vector.load %arg9[%c0_21, %c0_22] : memref<1x8xf32, #tpu.memory_space<vmem>>, vector<1x8xf32>
    %29 = vector.broadcast %28 : vector<1x8xf32> to vector<48x8xf32>
    %30 = arith.addf %27, %29 : vector<48x8xf32>
    %c0_23 = arith.constant 0 : index
    %c0_24 = arith.constant 0 : index
    %31 = vector.load %arg10[%c0_23, %c0_24] : memref<48x8xf32, #tpu.memory_space<vmem>>, vector<48x8xf32>
    tpu.vector_store %arg10[%c0_23, %c0_24], %30 {strides = array<i32>} : memref<48x8xf32, #tpu.memory_space<vmem>>, vector<48x8xf32>,
    return
  }
  func.func @transform_0(%arg0: i32) -> (i32, i32) {
    %c0_i32 = arith.constant 0 : i32
    %c0_i32_0 = arith.constant 0 : i32
    return %arg0, %c0_i32 : i32, i32
  }
  func.func @transform_1(%arg0: i32) -> (i32, i32) {
    %c0_i32 = arith.constant 0 : i32
    %c0_i32_0 = arith.constant 0 : i32
    %c0_i32_1 = arith.constant 0 : i32
    return %c0_i32, %c0_i32_0 : i32, i32
  }
  func.func @transform_2(%arg0: i32) -> (i32, i32) {
    %c0_i32 = arith.constant 0 : i32
    %c0_i32_0 = arith.constant 0 : i32
    %c0_i32_1 = arith.constant 0 : i32
    return %c0_i32, %c0_i32_0 : i32, i32
  }
  func.func @transform_3(%arg0: i32) -> (i32, i32) {
    %c0_i32 = arith.constant 0 : i32
    %c0_i32_0 = arith.constant 0 : i32
    %c0_i32_1 = arith.constant 0 : i32
    return %c0_i32, %c0_i32_0 : i32, i32
  }
  func.func @transform_4(%arg0: i32) -> (i32, i32) {
    %c0_i32 = arith.constant 0 : i32
    %c0_i32_0 = arith.constant 0 : i32
    %c0_i32_1 = arith.constant 0 : i32
    return %c0_i32, %c0_i32_0 : i32, i32
  }
  func.func @transform_5(%arg0: i32) -> (i32, i32) {
    %c0_i32 = arith.constant 0 : i32
    %c0_i32_0 = arith.constant 0 : i32
    %c0_i32_1 = arith.constant 0 : i32
    return %c0_i32, %c0_i32_0 : i32, i32
  }
  func.func @transform_6(%arg0: i32) -> (i32, i32) {
    %c0_i32 = arith.constant 0 : i32
    %c0_i32_0 = arith.constant 0 : i32
    %c0_i32_1 = arith.constant 0 : i32
    return %c0_i32, %c0_i32_0 : i32, i32
  }
  func.func @transform_7(%arg0: i32) -> (i32, i32) {
    %c0_i32 = arith.constant 0 : i32
    %c0_i32_0 = arith.constant 0 : i32
    %c0_i32_1 = arith.constant 0 : i32
    return %c0_i32, %c0_i32_0 : i32, i32
  }
  func.func @transform_8(%arg0: i32) -> (i32, i32) {
    %c0_i32 = arith.constant 0 : i32
    %c0_i32_0 = arith.constant 0 : i32
    %c0_i32_1 = arith.constant 0 : i32
    return %c0_i32, %c0_i32_0 : i32, i32
  }
  func.func @transform_9(%arg0: i32) -> (i32, i32) {
    %c0_i32 = arith.constant 0 : i32
    %c0_i32_0 = arith.constant 0 : i32
    return %arg0, %c0_i32 : i32, i32
  }
}

</mosaic_0001>

<bundles_post_ra>
// kernel: tpu_custom_call.1
= control target key start
LH: loop header
LB: loop body
LE: loop exit
PB: predicated region body
PF: predicated region fallthrough
CT: control target
= control target key end

     0   :  { %v621_v0 = vmov 0.0   ;;  %vm622_vm0 = vmmov 0   ;;  %vm57_vm1 = vcmask 130048   ;;  %vm172_vm2 = vcmask 523264   ;;  %s815_s1 = inlined_call_operand.vmem [shape: bf16[16,64], index: 1, kind: input, shape index: {}]   ;;  %s816_s0 = inlined_call_operand.vmem [shape: f32[48,16], index: 0, kind: input, shape index: {}]   ;;  %s817_s3 = inlined_call_operand.vmem [shape: bf16[64,64], index: 3, kind: input, shape index: {}]   ;;  %s818_s5 = inlined_call_operand.vmem [shape: bf16[64,64], index: 5, kind: input, shape index: {}]   ;;  %s819_s2 = inlined_call_operand.vmem [shape: f32[1,64], index: 2, kind: input, shape index: {}]   ;;  %s820_s7 = inlined_call_operand.vmem [shape: bf16[64,8], index: 7, kind: input, shape index: {}]   ;;  %s821_s4 = inlined_call_operand.vmem [shape: f32[1,64], index: 4, kind: input, shape index: {}]   ;;  %s822_s6 = inlined_call_operand.vmem [shape: f32[1,64], index: 6, kind: input, shape index: {}]   ;;  %s823_s8 = inlined_call_operand.vmem [shape: f32[1,8], index: 8, kind: input, shape index: {}]   ;;  %s824_s9 = inlined_call_operand.vmem [shape: f32[48,8], index: 9, kind: output, shape index: {}]  }
   0x1   :  { %532 = vmatprep.subr.bf16.mxu0 %v621_v0  ;;  %v608_v1 = vld [vmem:[%s815_s1] sm:$0xff]   ;;  %534 = vmatprep.mubr.msk.bf16.mxu0 %vm622_vm0, %v621_v0  ;;  %v34_v3 = vld [vmem:[%s816_s0 + $0x8] sm:$0xff]  ;;  %v35_v6 = vld [vmem:[%s816_s0 + $0x10] sm:$0xff]  ;;  %vm467_vm3 = vcmask 64512  }
   0x2   :  { %v33_v2 = vld [vmem:[%s816_s0] sm:$0xff]  ;;  %546 = vmatprep.subr.bf16.mxu1 %v621_v0  ;;  %554 = vmatprep.mubr.msk.bf16.mxu1 %vm622_vm0, %v621_v0  ;;  %v610_v7 = vld [vmem:[%s817_s3 + $0x8] sm:$0xff]   ;;  %v36_v8 = vld [vmem:[%s816_s0 + $0x18] sm:$0xff] }
   0x3   :  { %533 = vmatpush3.bf16.msra.mxu0 %v608_v1  ;;  %v39_v4 = vpack.c.bf16 %v34_v3, %v33_v2  ;;  %v609_v5 = vld [vmem:[%s817_s3] sm:$0xff]   ;;  %v40_v9 = vpack.c.bf16 %v36_v8, %v35_v6  ;;  %v38_v11 = vld [vmem:[%s816_s0 + $0x28] sm:$0xff]  ;;  %v611_v13 = vld [vmem:[%s817_s3 + $0x10] sm:$0xff]  }
   0x4   :  { %566 = vmatprep.subr.bf16.mxu0 %v621_v0  ;;  %547 = vmatpush3.bf16.msra.mxu1 %v609_v5  ;;  %v37_v10 = vld [vmem:[%s816_s0 + $0x20] sm:$0xff]  ;;  %v612_v14 = vld [vmem:[%s817_s3 + $0x18] sm:$0xff]   ;;  %v614_v16 = vld [vmem:[%s818_s5 + $0x8] sm:$0xff]  }
   0x5   :  { %548 = vmatprep.subr.bf16.mxu1 %v621_v0  ;;  %v41_v12 = vpack.c.bf16 %v38_v11, %v37_v10  ;;  %v613_v15 = vld [vmem:[%s818_s5] sm:$0xff]   ;;  %v615_v17 = vld [vmem:[%s818_s5 + $0x10] sm:$0xff]   ;;  %v616_v46 = vld [vmem:[%s818_s5 + $0x18] sm:$0xff]  }
   0x6   :  { %535 = vmatmul.mubr.msk.bf16.vlgmr.msra.gmra.mrb[0].mxu0 %vm57_vm1, %v39_v4  ;;  %v478_v18 = vld [vmem:[%s819_s2] ss:$0 sm:$0xff]  ;;  %v618_v48 = vld [vmem:[%s820_s7 + $0x8] sm:$0xff]   ;;  %v619_v49 = vld [vmem:[%s820_s7 + $0x10] sm:$0xff]  }
   0x7   :  { %538 = vmatprep.mubr.msk.bf16.mxu0 %vm622_vm0, %v621_v0  ;;  %567 = vmatpush3.bf16.msra.mxu0 %v613_v15  ;;  %v617_v47 = vld [vmem:[%s820_s7] sm:$0xff]   ;;  %v620_v15 = vld [vmem:[%s820_s7 + $0x18] sm:$0xff]  }
   0x8   :  { %549 = vmatpush3.bf16.msra.mxu1 %v610_v7  ;;  %568 = vmatprep.subr.bf16.mxu0 %v621_v0  ;;  %v483_v50 = vld [vmem:[%s821_s4] ss:$0 sm:$0xff] }
   0x9   :  { %550 = vmatprep.subr.bf16.mxu1 %v621_v0 }
   0xb   :  { %569 = vmatpush3.bf16.msra.mxu0 %v614_v16  ;;  %v491_v16 = vld [vmem:[%s822_s6] ss:$0 sm:$0xff] }
   0xc   :  { %551 = vmatpush3.bf16.msra.mxu1 %v611_v13  ;;  %570 = vmatprep.subr.bf16.mxu0 %v621_v0 }
   0xd   :  { %552 = vmatprep.subr.bf16.mxu1 %v621_v0 }
   0xe   :  { %539 = vmatmul.mubr.msk.bf16.gmra.mrb[4].mxu0 %vm57_vm1, %v40_v9 }
   0xf   :  { %542 = vmatprep.mubr.msk.bf16.mxu0 %vm622_vm0, %v621_v0  ;;  %571 = vmatpush3.bf16.msra.mxu0 %v615_v17 }
  0x10   :  { %553 = vmatpush3.bf16.msra.mxu1 %v612_v14  ;;  %572 = vmatprep.subr.bf16.mxu0 %v621_v0 }
  0x11   :  { %586 = vmatprep.subr.bf16.mxu1 %v621_v0 }
  0x13   :  { %573 = vmatpush3.bf16.msra.mxu0 %v616_v46 }
  0x16   :  { %543 = vmatmul.mubr.msk.bf16.gmra.mrb[8].mxu0 %vm57_vm1, %v41_v12 }
  0x17   :  { %574 = vmatprep.mubr.msk.bf16.mxu0 %vm622_vm0, %v621_v0 }
  0xd9   :  { %v101_v19 = vpop.f32.mrb[0].mxu0 }
  0xda   :  { %v102_v20 = vadd.f32 %v478_v18, %v101_v19  ;;  %v536_v21 = vpop.f32.mrb[1].mxu0 }
  0xdb   :  { %v104_v22 = vpop.f32.mrb[2].mxu0 }
  0xdc   :  { %v105_v23 = vadd.f32 %v478_v18, %v104_v22  ;;  %v537_v24 = vpop.f32.mrb[3].mxu0  ;;  %v124_v25 = vmax.f32 %v102_v20, 0.0 }
  0xde   :  { %v125_v26 = vmax.f32 %v105_v23, 0.0 }
  0xe0   :  { %v130_v27 = vpack.c.bf16 %v125_v26, %v124_v25 }
  0xe1   :  { %v109_v28 = vpop.f32.mrb[4].mxu0 }
  0xe2   :  { %v110_v29 = vadd.f32 %v478_v18, %v109_v28  ;;  %v540_v30 = vpop.f32.mrb[5].mxu0  ;;  %555 = vmatmul.mubr.msk.bf16.vlgmr.msra.gmra.mrb[0].mxu1 %vm172_vm2, %v130_v27 }
  0xe3   :  { %v112_v31 = vpop.f32.mrb[6].mxu0  ;;  %558 = vmatprep.mubr.msk.bf16.mxu1 %vm622_vm0, %v621_v0  ;;  %587 = vmatpush3.bf16.msra.mxu1 %v617_v47 }
  0xe4   :  { %v113_v32 = vadd.f32 %v478_v18, %v112_v31  ;;  %v541_v33 = vpop.f32.mrb[7].mxu0  ;;  %v126_v34 = vmax.f32 %v110_v29, 0.0  ;;  %588 = vmatprep.subr.bf16.mxu1 %v621_v0 }
  0xe6   :  { %v127_v35 = vmax.f32 %v113_v32, 0.0 }
  0xe7   :  { %589 = vmatpush3.bf16.msra.mxu1 %v618_v48 }
  0xe8   :  { %v131_v36 = vpack.c.bf16 %v127_v35, %v126_v34  ;;  %590 = vmatprep.subr.bf16.mxu1 %v621_v0 }
  0xe9   :  { %v117_v37 = vpop.f32.mrb[8].mxu0 }
  0xea   :  { %v118_v38 = vadd.f32 %v478_v18, %v117_v37  ;;  %v544_v39 = vpop.f32.mrb[9].mxu0  ;;  %559 = vmatmul.mubr.msk.bf16.gmra.mrb[4].mxu1 %vm172_vm2, %v131_v36 }
  0xeb   :  { %v120_v40 = vpop.f32.mrb[10].mxu0  ;;  %562 = vmatprep.mubr.msk.bf16.mxu1 %vm622_vm0, %v621_v0  ;;  %591 = vmatpush3.bf16.msra.mxu1 %v619_v49 }
  0xec   :  { %v121_v41 = vadd.f32 %v478_v18, %v120_v40  ;;  %v545_v42 = vpop.f32.mrb[11].mxu0  ;;  %v128_v43 = vmax.f32 %v118_v38, 0.0  ;;  %592 = vmatprep.subr.bf16.mxu1 %v621_v0 }
  0xee   :  { %v129_v44 = vmax.f32 %v121_v41, 0.0 }
  0xef   :  { %593 = vmatpush3.bf16.msra.mxu1 %v620_v15 }
  0xf0   :  { %v132_v45 = vpack.c.bf16 %v129_v44, %v128_v43  ;;  %v499_v44 = vld [vmem:[%s823_s8] ss:$0 sm:$0xff] }
  0xf2   :  { %563 = vmatmul.mubr.msk.bf16.gmra.mrb[8].mxu1 %vm172_vm2, %v132_v45 }
  0xf3   :  { %594 = vmatprep.mubr.msk.bf16.mxu1 %vm622_vm0, %v621_v0 }
 0x1b5   :  { %v216_v51 = vpop.f32.mrb[0].mxu1 }
 0x1b6   :  { %v217_v52 = vadd.f32 %v483_v50, %v216_v51  ;;  %v556_v53 = vpop.f32.mrb[1].mxu1 }
 0x1b7   :  { %v219_v54 = vpop.f32.mrb[2].mxu1 }
 0x1b8   :  { %v220_v55 = vadd.f32 %v483_v50, %v219_v54  ;;  %v557_v56 = vpop.f32.mrb[3].mxu1  ;;  %v239_v57 = vmax.f32 %v217_v52, 0.0 }
 0x1ba   :  { %v240_v58 = vmax.f32 %v220_v55, 0.0 }
 0x1bc   :  { %v245_v59 = vpack.c.bf16 %v240_v58, %v239_v57 }
 0x1bd   :  { %v224_v60 = vpop.f32.mrb[4].mxu1 }
 0x1be   :  { %v225_v61 = vadd.f32 %v483_v50, %v224_v60  ;;  %v560_v62 = vpop.f32.mrb[5].mxu1  ;;  %575 = vmatmul.mubr.msk.bf16.vlgmr.msra.gmra.mrb[12].mxu0 %vm172_vm2, %v245_v59 }
 0x1bf   :  { %v227_v63 = vpop.f32.mrb[6].mxu1  ;;  %578 = vmatprep.mubr.msk.bf16.mxu0 %vm622_vm0, %v621_v0 }
 0x1c0   :  { %v228_v1 = vadd.f32 %v483_v50, %v227_v63  ;;  %v561_v2 = vpop.f32.mrb[7].mxu1  ;;  %v241_v3 = vmax.f32 %v225_v61, 0.0 }
 0x1c2   :  { %v242_v4 = vmax.f32 %v228_v1, 0.0 }
 0x1c4   :  { %v246_v5 = vpack.c.bf16 %v242_v4, %v241_v3 }
 0x1c5   :  { %v232_v6 = vpop.f32.mrb[8].mxu1 }
 0x1c6   :  { %v233_v7 = vadd.f32 %v483_v50, %v232_v6  ;;  %v564_v8 = vpop.f32.mrb[9].mxu1  ;;  %579 = vmatmul.mubr.msk.bf16.gmra.mrb[16].mxu0 %vm172_vm2, %v246_v5 }
 0x1c7   :  { %v235_v9 = vpop.f32.mrb[10].mxu1  ;;  %582 = vmatprep.mubr.msk.bf16.mxu0 %vm622_vm0, %v621_v0 }
 0x1c8   :  { %v236_v10 = vadd.f32 %v483_v50, %v235_v9  ;;  %v565_v11 = vpop.f32.mrb[11].mxu1  ;;  %v243_v12 = vmax.f32 %v233_v7, 0.0 }
 0x1ca   :  { %v244_v13 = vmax.f32 %v236_v10, 0.0 }
 0x1cc   :  { %v247_v14 = vpack.c.bf16 %v244_v13, %v243_v12 }
 0x1ce   :  { %583 = vmatmul.mubr.msk.bf16.gmra.mrb[20].mxu0 %vm172_vm2, %v247_v14 }
 0x291   :  { %v330_v17 = vpop.f32.mrb[12].mxu0 }
 0x292   :  { %v331_v18 = vadd.f32 %v491_v16, %v330_v17  ;;  %v576_v19 = vpop.f32.mrb[13].mxu0 }
 0x293   :  { %v333_v20 = vpop.f32.mrb[14].mxu0 }
 0x294   :  { %v334_v21 = vadd.f32 %v491_v16, %v333_v20  ;;  %v577_v22 = vpop.f32.mrb[15].mxu0  ;;  %v353_v23 = vmax.f32 %v331_v18, 0.0 }
 0x296   :  { %v354_v24 = vmax.f32 %v334_v21, 0.0 }
 0x298   :  { %v359_v25 = vpack.c.bf16 %v354_v24, %v353_v23 }
 0x299   :  { %v338_v26 = vpop.f32.mrb[16].mxu0 }
 0x29a   :  { %v339_v27 = vadd.f32 %v491_v16, %v338_v26  ;;  %v580_v28 = vpop.f32.mrb[17].mxu0  ;;  %595 = vmatmul.mubr.msk.bf16.vlgmr.msra.gmra.mrb[12].mxu1 %vm172_vm2, %v359_v25 }
 0x29b   :  { %v341_v29 = vpop.f32.mrb[18].mxu0  ;;  %598 = vmatprep.mubr.msk.bf16.mxu1 %vm622_vm0, %v621_v0 }
 0x29c   :  { %v342_v30 = vadd.f32 %v491_v16, %v341_v29  ;;  %v581_v31 = vpop.f32.mrb[19].mxu0  ;;  %v355_v32 = vmax.f32 %v339_v27, 0.0 }
 0x29e   :  { %v356_v33 = vmax.f32 %v342_v30, 0.0 }
 0x2a0   :  { %v360_v34 = vpack.c.bf16 %v356_v33, %v355_v32 }
 0x2a1   :  { %v346_v35 = vpop.f32.mrb[20].mxu0 }
 0x2a2   :  { %v347_v36 = vadd.f32 %v491_v16, %v346_v35  ;;  %v584_v37 = vpop.f32.mrb[21].mxu0  ;;  %599 = vmatmul.mubr.msk.bf16.gmra.mrb[16].mxu1 %vm172_vm2, %v360_v34 }
 0x2a3   :  { %v349_v38 = vpop.f32.mrb[22].mxu0  ;;  %602 = vmatprep.mubr.msk.bf16.mxu1 %vm622_vm0, %v621_v0 }
 0x2a4   :  { %v350_v39 = vadd.f32 %v491_v16, %v349_v38  ;;  %v585_v40 = vpop.f32.mrb[23].mxu0  ;;  %v357_v41 = vmax.f32 %v347_v36, 0.0 }
 0x2a6   :  { %v358_v42 = vmax.f32 %v350_v39, 0.0 }
 0x2a8   :  { %v361_v43 = vpack.c.bf16 %v358_v42, %v357_v41 }
 0x2aa   :  { %603 = vmatmul.mubr.msk.bf16.gmra.mrb[20].mxu1 %vm172_vm2, %v361_v43 }
 0x36d   :  { %v444_v45 = vpop.f32.mrb[12].mxu1 }
 0x36e   :  { %v445_v46 = vadd.f32 %v499_v44, %v444_v45  ;;  %v596_v47 = vpop.f32.mrb[13].mxu1 }
 0x36f   :  { %v447_v48 = vpop.f32.mrb[14].mxu1 }
 0x370   :  { %468 = vst.msk [vmem:[%s824_s9] sm:$0xff] %vm467_vm3, %v445_v46  ;;  %v448_v0 = vadd.f32 %v499_v44, %v447_v48  ;;  %v597_v49 = vpop.f32.mrb[15].mxu1 }
 0x372   :  { %469 = vst.msk [vmem:[%s824_s9 + $0x8] sm:$0xff] %vm467_vm3, %v448_v0 }
 0x375   :  { %v452_v50 = vpop.f32.mrb[16].mxu1 }
 0x376   :  { %v453_v51 = vadd.f32 %v499_v44, %v452_v50  ;;  %v600_v52 = vpop.f32.mrb[17].mxu1 }
 0x377   :  { %v455_v53 = vpop.f32.mrb[18].mxu1 }
 0x378   :  { %470 = vst.msk [vmem:[%s824_s9 + $0x10] sm:$0xff] %vm467_vm3, %v453_v51  ;;  %v456_v54 = vadd.f32 %v499_v44, %v455_v53  ;;  %v601_v55 = vpop.f32.mrb[19].mxu1 }
 0x37a   :  { %471 = vst.msk [vmem:[%s824_s9 + $0x18] sm:$0xff] %vm467_vm3, %v456_v54 }
 0x37d   :  { %v460_v56 = vpop.f32.mrb[20].mxu1 }
 0x37e   :  { %v461_v57 = vadd.f32 %v499_v44, %v460_v56  ;;  %v604_v58 = vpop.f32.mrb[21].mxu1 }
 0x37f   :  { %v463_v59 = vpop.f32.mrb[22].mxu1 }
 0x380   :  { %472 = vst.msk [vmem:[%s824_s9 + $0x20] sm:$0xff] %vm467_vm3, %v461_v57  ;;  %v464_v60 = vadd.f32 %v499_v44, %v463_v59  ;;  %v605_v61 = vpop.f32.mrb[23].mxu1 }
 0x382   :  { %473 = vst.msk [vmem:[%s824_s9 + $0x28] sm:$0xff] %vm467_vm3, %v464_v60 }

</bundles_post_ra>
